<compile_context>
chip_gen: v7x
topology: tpu7x:2x2x1
jax: 0.10.0
libtpu: 0.0.40
codegen_flags: <defaults>
</compile_context>

<pallas_src>
import functools

import jax
import jax.numpy as jnp
from jax.experimental import pallas as pl
from jax.experimental.pallas import tpu as pltpu

GROUP = 8  # batch rows folded per sublane row (f32 sublane count)


def _mlp_kernel(x_ref, w1_ref, b1_ref, w2_ref, b2_ref, w3_ref, b3_ref, o_ref):
    # x_ref: (TG, 8*in) -- 8 batch rows per sublane row, lane-dense.
    x = x_ref[...]

    # fc1 + ReLU   (block-diagonal weight -> plain NN matmul, tiny stationary)
    h = jnp.dot(x, w1_ref[...], preferred_element_type=jnp.float32)
    h = jnp.maximum(h + b1_ref[...], 0.0)

    # fc2 + ReLU
    h = jnp.dot(h, w2_ref[...], preferred_element_type=jnp.float32)
    h = jnp.maximum(h + b2_ref[...], 0.0)

    # out + Sigmoid (exact: exp on EUP, divide on VPU -- both have slack)
    z = jnp.dot(h, w3_ref[...], preferred_element_type=jnp.float32)
    z = z + b3_ref[...]
    o_ref[...] = (1.0 / (1.0 + jnp.exp(-z))).astype(o_ref.dtype)


@functools.partial(jax.jit, static_argnames=("batch_tile",))
def mlp_forward(x, w1, b1, w2, b2, w3, b3, *, batch_tile=16384):
    """x: (B, in_features) f32.  Weights in PyTorch (out, in) layout, biases (out,).

    Returns (B, out_features), matching Model.forward.
    """
    B, in_features = x.shape
    h1 = w1.shape[0]
    h2 = w2.shape[0]
    out_features = w3.shape[0]

    f32 = jnp.float32

    # ---- pack 8 batch rows per sublane row (bitcast-able reshape) ----------
    pad_rows = (-B) % GROUP
    if pad_rows:
        x = jnp.pad(x, ((0, pad_rows), (0, 0)))          # at most 7 rows
    Bp = B + pad_rows
    G = Bp // GROUP
    xg = x.astype(f32).reshape(G, GROUP * in_features)    # (G, 88), contiguous

    # ---- block-diagonal weights: packed layout becomes a plain matmul ------
    eye = jnp.eye(GROUP, dtype=f32)
    w1b = jnp.kron(eye, w1.T.astype(f32))                 # (8*in, 8*h1)
    w2b = jnp.kron(eye, w2.T.astype(f32))                 # (8*h1, 8*h2)
    w3b = jnp.kron(eye, w3.T.astype(f32))                 # (8*h2, 8*out)
    b1t = jnp.tile(b1.astype(f32), GROUP).reshape(1, GROUP * h1)
    b2t = jnp.tile(b2.astype(f32), GROUP).reshape(1, GROUP * h2)
    b3t = jnp.tile(b3.astype(f32), GROUP).reshape(1, GROUP * out_features)

    PIN = GROUP * in_features
    POUT = GROUP * out_features

    # ---- batch tiling (in groups of 8 rows) --------------------------------
    req_tg = max(1, batch_tile // GROUP)
    TG = min(req_tg, G)
    # v7x megacore: keep >= 2 grid steps along the "parallel" axis when possible
    half = pl.cdiv(G, 2)
    if TG > half:
        TG = half
    if TG < G:
        # sublane dim of a block must be a multiple of 8 (or the full extent)
        TG = min(((TG + 7) // 8) * 8, G)
    grid = (pl.cdiv(G, TG),)   # ragged last block is masked by Pallas

    out = pl.pallas_call(
        _mlp_kernel,
        out_shape=jax.ShapeDtypeStruct((G, POUT), f32),
        grid=grid,
        in_specs=[
            # streamed, double-buffered activation tile
            pl.BlockSpec((TG, PIN), lambda i: (i, 0)),
            # weights / biases: constant index_map -> VMEM-resident
            pl.BlockSpec((PIN, GROUP * h1), lambda i: (0, 0)),
            pl.BlockSpec((1, GROUP * h1), lambda i: (0, 0)),
            pl.BlockSpec((GROUP * h1, GROUP * h2), lambda i: (0, 0)),
            pl.BlockSpec((1, GROUP * h2), lambda i: (0, 0)),
            pl.BlockSpec((GROUP * h2, POUT), lambda i: (0, 0)),
            pl.BlockSpec((1, POUT), lambda i: (0, 0)),
        ],
        out_specs=pl.BlockSpec((TG, POUT), lambda i: (i, 0)),
        compiler_params=pltpu.CompilerParams(
            dimension_semantics=("parallel",),   # megacore split on v7x
        ),
    )(xg, w1b, b1t, w2b, b2t, w3b, b3t)

    # (G, 8*out) rows are [8i+0 .. 8i+7] blocks -> free reshape to (Bp, out)
    y = out.reshape(Bp, out_features)
    return y[:B] if pad_rows else y


def init_params(key, in_features=11, h1=11, h2=11, out_features=1):
    """nn.Linear-style init U(-1/sqrt(fan_in), 1/sqrt(fan_in)); (out, in) layout."""
    ks = jax.random.split(key, 6)

    def lin(kw, kb, fan_in, fan_out):
        bound = 1.0 / float(fan_in) ** 0.5
        w = jax.random.uniform(kw, (fan_out, fan_in), jnp.float32, -bound, bound)
        b = jax.random.uniform(kb, (fan_out,), jnp.float32, -bound, bound)
        return w, b

    w1, b1 = lin(ks[0], ks[1], in_features, h1)
    w2, b2 = lin(ks[2], ks[3], h1, h2)
    w3, b3 = lin(ks[4], ks[5], h2, out_features)
    return w1, b1, w2, b2, w3, b3


def ref_forward(x, w1, b1, w2, b2, w3, b3):
    h = jnp.maximum(x @ w1.T + b1, 0.0)
    h = jnp.maximum(h @ w2.T + b2, 0.0)
    return jax.nn.sigmoid(h @ w3.T + b3)


if __name__ == "__main__":
    key = jax.random.PRNGKey(0)
    kx, kp = jax.random.split(key)
    params = init_params(kp)

    # Case 1: B multiple of 8, default tile -> grid of 2 with a ragged block.
    B, IN = 200, 11
    x = jax.random.normal(kx, (B, IN), jnp.float32)
    out = jax.block_until_ready(mlp_forward(x, *params))
    ref = ref_forward(x, *params)
    assert out.shape == (B, 1)
    assert jnp.allclose(out, ref, atol=3e-3), "mismatch vs reference (case 1)"

    # Case 2: B not a multiple of 8, tiny tile -> pad-to-8 path, grid=4,
    # ragged final block.
    B2 = 203
    x2 = jax.random.normal(jax.random.PRNGKey(1), (B2, IN), jnp.float32)
    out2 = jax.block_until_ready(mlp_forward(x2, *params, batch_tile=64))
    ref2 = ref_forward(x2, *params)
    assert out2.shape == (B2, 1)
    assert jnp.allclose(out2, ref2, atol=3e-3), "mismatch vs reference (case 2)"

    print("KERNEL_OK")
</pallas_src>

<mosaic_0001>
module attributes {stable_mosaic.version = 11 : i64} {
  func.func @_mlp_kernel(%arg0: i32, %arg1: memref<16x88xf32, #tpu.memory_space<vmem>>, %arg2: memref<88x88xf32, #tpu.memory_space<vmem>>, %arg3: memref<1x88xf32, #tpu.memory_space<vmem>>, %arg4: memref<88x88xf32, #tpu.memory_space<vmem>>, %arg5: memref<1x88xf32, #tpu.memory_space<vmem>>, %arg6: memref<88x8xf32, #tpu.memory_space<vmem>>, %arg7: memref<1x8xf32, #tpu.memory_space<vmem>>, %arg8: memref<16x8xf32, #tpu.memory_space<vmem>>) attributes {dimension_semantics = [#tpu.dimension_semantics<parallel>], iteration_bounds = array<i64: 2>, scalar_prefetch = 0 : i64, scratch_operands = 0 : i64, tpu.core_type = #tpu.core_type<tc>, window_params = [{transform_indices = @transform_0, window_bounds = array<i64: 16, 88>}, {pipeline_mode = #tpu.pipeline_mode<synchronous>, transform_indices = @transform_1, window_bounds = array<i64: 88, 88>}, {pipeline_mode = #tpu.pipeline_mode<synchronous>, transform_indices = @transform_2, window_bounds = array<i64: 1, 88>}, {pipeline_mode = #tpu.pipeline_mode<synchronous>, transform_indices = @transform_3, window_bounds = array<i64: 88, 88>}, {pipeline_mode = #tpu.pipeline_mode<synchronous>, transform_indices = @transform_4, window_bounds = array<i64: 1, 88>}, {pipeline_mode = #tpu.pipeline_mode<synchronous>, transform_indices = @transform_5, window_bounds = array<i64: 88, 8>}, {pipeline_mode = #tpu.pipeline_mode<synchronous>, transform_indices = @transform_6, window_bounds = array<i64: 1, 8>}, {transform_indices = @transform_7, window_bounds = array<i64: 16, 8>}]} {
    %c0 = arith.constant 0 : index
    %c0_0 = arith.constant 0 : index
    %0 = vector.load %arg1[%c0, %c0_0] : memref<16x88xf32, #tpu.memory_space<vmem>>, vector<16x88xf32>
    %c0_1 = arith.constant 0 : index
    %c0_2 = arith.constant 0 : index
    %1 = vector.load %arg2[%c0_1, %c0_2] : memref<88x88xf32, #tpu.memory_space<vmem>>, vector<88x88xf32>
    %cst = arith.constant dense<0.000000e+00> : vector<16x88xf32>
    %2 = tpu.matmul %0, %1, %cst {dimension_numbers = #tpu.dot_dimension_numbers<[1], [0], [0], [1], [0, 0, 1, 1], [], []>} : vector<16x88xf32>, vector<88x88xf32>, vector<16x88xf32> -> vector<16x88xf32>
    %c0_3 = arith.constant 0 : index
    %c0_4 = arith.constant 0 : index
    %3 = vector.load %arg3[%c0_3, %c0_4] : memref<1x88xf32, #tpu.memory_space<vmem>>, vector<1x88xf32>
    %4 = vector.broadcast %3 : vector<1x88xf32> to vector<16x88xf32>
    %5 = arith.addf %2, %4 : vector<16x88xf32>
    %cst_5 = arith.constant 0.000000e+00 : f32
    %6 = vector.broadcast %cst_5 : f32 to vector<16x88xf32>
    %7 = arith.maximumf %5, %6 : vector<16x88xf32>
    %c0_6 = arith.constant 0 : index
    %c0_7 = arith.constant 0 : index
    %8 = vector.load %arg4[%c0_6, %c0_7] : memref<88x88xf32, #tpu.memory_space<vmem>>, vector<88x88xf32>
    %cst_8 = arith.constant dense<0.000000e+00> : vector<16x88xf32>
    %9 = tpu.matmul %7, %8, %cst_8 {dimension_numbers = #tpu.dot_dimension_numbers<[1], [0], [0], [1], [0, 0, 1, 1], [], []>} : vector<16x88xf32>, vector<88x88xf32>, vector<16x88xf32> -> vector<16x88xf32>
    %c0_9 = arith.constant 0 : index
    %c0_10 = arith.constant 0 : index
    %10 = vector.load %arg5[%c0_9, %c0_10] : memref<1x88xf32, #tpu.memory_space<vmem>>, vector<1x88xf32>
    %11 = vector.broadcast %10 : vector<1x88xf32> to vector<16x88xf32>
    %12 = arith.addf %9, %11 : vector<16x88xf32>
    %cst_11 = arith.constant 0.000000e+00 : f32
    %13 = vector.broadcast %cst_11 : f32 to vector<16x88xf32>
    %14 = arith.maximumf %12, %13 : vector<16x88xf32>
    %c0_12 = arith.constant 0 : index
    %c0_13 = arith.constant 0 : index
    %15 = vector.load %arg6[%c0_12, %c0_13] : memref<88x8xf32, #tpu.memory_space<vmem>>, vector<88x8xf32>
    %cst_14 = arith.constant dense<0.000000e+00> : vector<16x8xf32>
    %16 = tpu.matmul %14, %15, %cst_14 {dimension_numbers = #tpu.dot_dimension_numbers<[1], [0], [0], [1], [0, 0, 1, 1], [], []>} : vector<16x88xf32>, vector<88x8xf32>, vector<16x8xf32> -> vector<16x8xf32>
    %c0_15 = arith.constant 0 : index
    %c0_16 = arith.constant 0 : index
    %17 = vector.load %arg7[%c0_15, %c0_16] : memref<1x8xf32, #tpu.memory_space<vmem>>, vector<1x8xf32>
    %18 = vector.broadcast %17 : vector<1x8xf32> to vector<16x8xf32>
    %19 = arith.addf %16, %18 : vector<16x8xf32>
    %cst_17 = arith.constant 0.000000e+00 : f32
    %20 = vector.broadcast %cst_17 : f32 to vector<16x8xf32>
    %21 = arith.subf %20, %19 : vector<16x8xf32>
    %22 = math.exp %21 : vector<16x8xf32>
    %cst_18 = arith.constant 1.000000e+00 : f32
    %23 = vector.broadcast %cst_18 : f32 to vector<16x8xf32>
    %24 = arith.addf %23, %22 : vector<16x8xf32>
    %cst_19 = arith.constant 1.000000e+00 : f32
    %25 = vector.broadcast %cst_19 : f32 to vector<16x8xf32>
    %26 = arith.divf %25, %24 : vector<16x8xf32>
    %c0_20 = arith.constant 0 : index
    %c0_21 = arith.constant 0 : index
    %27 = vector.load %arg8[%c0_20, %c0_21] : memref<16x8xf32, #tpu.memory_space<vmem>>, vector<16x8xf32>
    tpu.vector_store %arg8[%c0_20, %c0_21], %26 {strides = array<i32>} : memref<16x8xf32, #tpu.memory_space<vmem>>, vector<16x8xf32>,
    return
  }
  func.func @transform_0(%arg0: i32) -> (i32, i32) {
    %c0_i32 = arith.constant 0 : i32
    %c0_i32_0 = arith.constant 0 : i32
    return %arg0, %c0_i32 : i32, i32
  }
  func.func @transform_1(%arg0: i32) -> (i32, i32) {
    %c0_i32 = arith.constant 0 : i32
    %c0_i32_0 = arith.constant 0 : i32
    %c0_i32_1 = arith.constant 0 : i32
    return %c0_i32, %c0_i32_0 : i32, i32
  }
  func.func @transform_2(%arg0: i32) -> (i32, i32) {
    %c0_i32 = arith.constant 0 : i32
    %c0_i32_0 = arith.constant 0 : i32
    %c0_i32_1 = arith.constant 0 : i32
    return %c0_i32, %c0_i32_0 : i32, i32
  }
  func.func @transform_3(%arg0: i32) -> (i32, i32) {
    %c0_i32 = arith.constant 0 : i32
    %c0_i32_0 = arith.constant 0 : i32
    %c0_i32_1 = arith.constant 0 : i32
    return %c0_i32, %c0_i32_0 : i32, i32
  }
  func.func @transform_4(%arg0: i32) -> (i32, i32) {
    %c0_i32 = arith.constant 0 : i32
    %c0_i32_0 = arith.constant 0 : i32
    %c0_i32_1 = arith.constant 0 : i32
    return %c0_i32, %c0_i32_0 : i32, i32
  }
  func.func @transform_5(%arg0: i32) -> (i32, i32) {
    %c0_i32 = arith.constant 0 : i32
    %c0_i32_0 = arith.constant 0 : i32
    %c0_i32_1 = arith.constant 0 : i32
    return %c0_i32, %c0_i32_0 : i32, i32
  }
  func.func @transform_6(%arg0: i32) -> (i32, i32) {
    %c0_i32 = arith.constant 0 : i32
    %c0_i32_0 = arith.constant 0 : i32
    %c0_i32_1 = arith.constant 0 : i32
    return %c0_i32, %c0_i32_0 : i32, i32
  }
  func.func @transform_7(%arg0: i32) -> (i32, i32) {
    %c0_i32 = arith.constant 0 : i32
    %c0_i32_0 = arith.constant 0 : i32
    return %arg0, %c0_i32 : i32, i32
  }
}

</mosaic_0001>

<bundles_post_ra>
// kernel: tile.19
= control target key start
LH: loop header
LB: loop body
LE: loop exit
PB: predicated region body
PF: predicated region fallthrough
CT: control target
= control target key end

     0   :  { %s67_s10 = smov 77   ;;  %s68_s11 = smov 55   ;;  %vm3_vm0 = vcmask 89088   ;;  %vm9_vm1 = vcmask 720488   ;;  %vm15_vm2 = vcmask 630288   ;;  %vm21_vm3 = vcmask 540088   ;;  %s111_s0 = inlined_call_operand.vmem [shape: f32[8,11], index: 0, kind: input, shape index: {}]   ;;  %s112_s1 = inlined_call_operand.vmem [shape: f32[1,88], index: 1, kind: output, shape index: {}]  }
   0x1   :  { %v53_v0 = vld [vmem:[%s111_s0 + $0x7] sm:$0x1]   ;;  %v55_v1 = vld [vmem:[%s111_s0 + $0x5] sm:$0x1]   ;;  %v54_v2 = vld [vmem:[%s111_s0 + $0x6] sm:$0x1]  }
   0x2   :  { %7 = vrot.lane.b32.xlu0 %v53_v0, %s67_s10  ;;  %19 = vrot.lane.b32.xlu1 %v55_v1, %s68_s11  ;;  %v56_v3 = vld [vmem:[%s111_s0 + $0x4] sm:$0x1]   ;;  %v2_v4 = vld [vmem:[%s111_s0] sm:$0x1]   ;;  %s69_s18 = smov 66   ;;  %s70_s19 = smov 44  }
   0x3   :  { %4 = vst.msk [vmem:[#allocation0] sm:$0x1] %vm3_vm0, %v2_v4   ;;  %v57_v5 = vld [vmem:[%s111_s0 + $0x3] sm:$0x1]   ;;  %v58_v6 = vld [vmem:[%s111_s0 + $0x2] sm:$0x1]  }
   0x4   :  { %s71_s24 = smov 33   ;;  %s72_s25 = smov 22   ;;  %v59_v7 = vld [vmem:[%s111_s0 + $0x1] sm:$0x1]   ;;  %vm27_vm4 = vcmask 449888   ;;  %vm33_vm5 = vcmask 359688  }
   0x5   :  { %s73_s0 = smov 11   ;;  %vm39_vm6 = vcmask 269488   ;;  %vm45_vm7 = vcmask 179288  }
   0x6   :  { %13 = vrot.lane.b32.xlu0 %v54_v2, %s69_s18  ;;  %25 = vrot.lane.b32.xlu1 %v56_v3, %s70_s19 }
   0xa   :  { %31 = vrot.lane.b32.xlu0 %v57_v5, %s71_s24  ;;  %37 = vrot.lane.b32.xlu1 %v58_v6, %s72_s25 }
   0xe   :  { %43 = vrot.lane.b32.xlu0 %v59_v7, %s73_s0 }
  0x74   :  { %v8_v8 = vpop.permute.xlu0 %7   ;;  %v20_v9 = vpop.permute.xlu1 %19  }
  0x75   :  { %10 = vst.msk [vmem:[#allocation0] sm:$0x1] %vm9_vm1, %v8_v8  }
  0x78   :  { %v14_v10 = vpop.permute.xlu0 %13   ;;  %v26_v11 = vpop.permute.xlu1 %25  }
  0x79   :  { %16 = vst.msk [vmem:[#allocation0] sm:$0x1] %vm15_vm2, %v14_v10  }
  0x7a   :  { %22 = vst.msk [vmem:[#allocation0] sm:$0x1] %vm21_vm3, %v20_v9  }
  0x7b   :  { %28 = vst.msk [vmem:[#allocation0] sm:$0x1] %vm27_vm4, %v26_v11  }
  0x7c   :  { %v32_v12 = vpop.permute.xlu0 %31   ;;  %v38_v13 = vpop.permute.xlu1 %37  }
  0x7d   :  { %34 = vst.msk [vmem:[#allocation0] sm:$0x1] %vm33_vm5, %v32_v12  }
  0x7e   :  { %40 = vst.msk [vmem:[#allocation0] sm:$0x1] %vm39_vm6, %v38_v13  }
  0x80   :  { %v44_v14 = vpop.permute.xlu0 %43  }
  0x81   :  { %46 = vst.msk [vmem:[#allocation0] sm:$0x1] %vm45_vm7, %v44_v14  }
  0x88   :  { %v50_v15 = vld [vmem:[#allocation0] sm:$0x1] }
  0x89   :  { %52 = vst [vmem:[%s112_s1] sm:$0x1] %v50_v15 }

// kernel: mlp_forward.1
= control target key start
LH: loop header
LB: loop body
LE: loop exit
PB: predicated region body
PF: predicated region fallthrough
CT: control target
= control target key end

     0   :  { %s915_s24 = smov 0   ;;  %s1057_s0 = inlined_call_operand.vmem [shape: f32[25,88], index: 0, kind: input, shape index: {}]   ;;  %s1058_s1 = inlined_call_operand.vmem [shape: f32[88,88], index: 1, kind: input, shape index: {}]   ;;  %s1059_s2 = inlined_call_operand.vmem [shape: f32[1,88], index: 2, kind: input, shape index: {}]   ;;  %s1060_s3 = inlined_call_operand.vmem [shape: f32[88,88], index: 3, kind: input, shape index: {}]   ;;  %s1061_s4 = inlined_call_operand.vmem [shape: f32[1,88], index: 4, kind: input, shape index: {}]   ;;  %s1062_s5 = inlined_call_operand.vmem [shape: f32[88,8], index: 5, kind: input, shape index: {}]   ;;  %s1063_s6 = inlined_call_operand.vmem [shape: f32[1,8], index: 6, kind: input, shape index: {}]   ;;  %s1064_s7 = inlined_call_operand.vmem [shape: f32[25,8], index: 7, kind: output, shape index: {}]  }
   0x1 LB: > { %s657_s25 = sadd.s32 4294967295, %s873_s24   ;;  %p661_p0 = scmp.ge.s32.totalorder %s873_s24, 1  ;;  %s873_s24 = sphi %s915_s24, %s17_s24  }
   0x2   : > { %p238_p1 = scmp.lt.s32.totalorder %s873_s24, 3 }
   0x4   : > { %p239_p2 = pnand %p661_p0, %p238_p1 }
   0x5   : > { %v284_v0 = vld [vmem:[%s1058_s1] sm:$0xff] (!%p239_p2)  ;;  %v285_v1 = vld [vmem:[%s1058_s1 + $0x8] sm:$0xff] (!%p239_p2)  ;;  %v286_v2 = vld [vmem:[%s1058_s1 + $0x10] sm:$0xff] (!%p239_p2)  ;;  %s662_s9 = sshll.u32 (!%p239_p2), %s657_s25, 1  ;;  %vm302_vm0 = vcmask (!%p239_p2), 719872   ;;  %vm598_vm1 = vcmask (!%p239_p2), 64512  }
   0x6   : > { %242 = sbr.rel (%p239_p2) target bundleno = 711 (0x2c7), region = 48  ;;  %v791_v3 = vpack.c.bf16 (!%p239_p2), %v285_v1, %v284_v0  ;;  %v287_v4 = vld [vmem:[%s1058_s1 + $0x18] sm:$0xff] (!%p239_p2)  ;;  %p271_p3 = scmp.lt.s32.totalorder (!%p239_p2), %s662_s9, 3  ;;  %v288_v6 = vld [vmem:[%s1058_s1 + $0x20] sm:$0xff] (!%p239_p2)  ;;  %v289_v7 = vld [vmem:[%s1058_s1 + $0x28] sm:$0xff] (!%p239_p2) }
   0x7   : > { %v795_v5 = vpack.c.bf16 (!%p239_p2), %v287_v4, %v286_v2  ;;  %v386_v8 = vld [vmem:[%s1060_s3] sm:$0xff] (!%p239_p2)  ;;  %v387_v9 = vld [vmem:[%s1060_s3 + $0x8] sm:$0xff] (!%p239_p2)  ;;  %v388_v10 = vld [vmem:[%s1060_s3 + $0x10] sm:$0xff] (!%p239_p2)  ;;  %v799_v12 = vpack.c.bf16 (!%p239_p2), %v289_v7, %v288_v6 }
   0x8   : > { %792 = vmatprep.subr.bf16.mxu0 (!%p239_p2), %v791_v3  ;;  %v389_v11 = vld [vmem:[%s1060_s3 + $0x18] sm:$0xff] (!%p239_p2)  ;;  %v811_v13 = vpack.c.bf16 (!%p239_p2), %v387_v9, %v386_v8  ;;  %v290_v14 = vld [vmem:[%s1058_s1 + $0x30] sm:$0xff] (!%p239_p2)  ;;  %v390_v18 = vld [vmem:[%s1060_s3 + $0x20] sm:$0xff] (!%p239_p2) }
   0x9   : > { %794 = vmatpush3.bf16.msra.mxu0 (!%p239_p2), %v791_v3  ;;  %v291_v15 = vld [vmem:[%s1058_s1 + $0x38] sm:$0xff] (!%p239_p2)  ;;  %v815_v16 = vpack.c.bf16 (!%p239_p2), %v389_v11, %v388_v10  ;;  %v391_v19 = vld [vmem:[%s1060_s3 + $0x28] sm:$0xff] (!%p239_p2)  ;;  %v292_v21 = vld [vmem:[%s1058_s1 + $0x40] sm:$0xff] (!%p239_p2) }
   0xa   : > { %796 = vmatprep.subr.bf16.mxu0 (!%p239_p2), %v795_v5  ;;  %812 = vmatprep.subr.bf16.mxu1 (!%p239_p2), %v811_v13  ;;  %v803_v20 = vpack.c.bf16 (!%p239_p2), %v291_v15, %v290_v14  ;;  %v293_v22 = vld [vmem:[%s1058_s1 + $0x48] sm:$0xff] (!%p239_p2)  ;;  %v819_v23 = vpack.c.bf16 (!%p239_p2), %v391_v19, %v390_v18  ;;  %v392_v24 = vld [vmem:[%s1060_s3 + $0x30] sm:$0xff] (!%p239_p2)  ;;  %v393_v25 = vld [vmem:[%s1060_s3 + $0x38] sm:$0xff] (!%p239_p2) }
   0xb   : > { %814 = vmatpush3.bf16.msra.mxu1 (!%p239_p2), %v811_v13  ;;  %v807_v26 = vpack.c.bf16 (!%p239_p2), %v293_v22, %v292_v21  ;;  %v823_v27 = vpack.c.bf16 (!%p239_p2), %v393_v25, %v392_v24  ;;  %v294_v28 = vld [vmem:[%s1058_s1 + $0x50] sm:$0xff] (!%p239_p2)  ;;  %v394_v30 = vld [vmem:[%s1060_s3 + $0x40] sm:$0xff] (!%p239_p2)  ;;  %v395_v31 = vld [vmem:[%s1060_s3 + $0x48] sm:$0xff] (!%p239_p2) }
   0xc   : > { %816 = vmatprep.subr.bf16.mxu1 (!%p239_p2), %v815_v16  ;;  %v827_v32 = vpack.c.bf16 (!%p239_p2), %v395_v31, %v394_v30  ;;  %v396_v33 = vld [vmem:[%s1060_s3 + $0x50] sm:$0xff] (!%p239_p2)  ;;  %v487_v34 = vld [vmem:[%s1062_s5] sm:$0xff] (!%p239_p2)  ;;  %v488_v35 = vld [vmem:[%s1062_s5 + $0x8] sm:$0xff] (!%p239_p2) }
   0xd   : > { %s1066_s9 = smov (!%p271_p3, %s662_s9), 3  ;;  %798 = vmatpush3.bf16.msra.mxu0 %v795_v5  ;;  %v489_v36 = vld [vmem:[%s1062_s5 + $0x10] sm:$0xff]  ;;  %v831_v37 = vpack.c.bf16 %v488_v35, %v487_v34  ;;  %v490_v38 = vld [vmem:[%s1062_s5 + $0x18] sm:$0xff]  ;;  %v491_v40 = vld [vmem:[%s1062_s5 + $0x20] sm:$0xff] }
   0xe   : > { %s663_s25 = sshll.u32 %s1066_s9, 3  ;;  %800 = vmatprep.subr.bf16.mxu0 %v799_v12  ;;  %v835_v39 = vpack.c.bf16 %v490_v38, %v489_v36  ;;  %v492_v41 = vld [vmem:[%s1062_s5 + $0x28] sm:$0xff]  ;;  %v493_v43 = vld [vmem:[%s1062_s5 + $0x30] sm:$0xff]  ;;  %v494_v44 = vld [vmem:[%s1062_s5 + $0x38] sm:$0xff] }
   0xf   : > { %s967_s10 = scalar_lea.vmem %s1057_s0, %s663_s25  ;;  %818 = vmatpush3.bf16.msra.mxu1 %v815_v16  ;;  %v839_v42 = vpack.c.bf16 %v492_v41, %v491_v40  ;;  %v843_v45 = vpack.c.bf16 %v494_v44, %v493_v43  ;;  %v666_v46 = vld [vmem:[%s1059_s2] ss:$0 sm:$0xff]  ;;  %v496_v54 = vld [vmem:[%s1062_s5 + $0x48] sm:$0xff]  ;;  %v497_v56 = vld [vmem:[%s1062_s5 + $0x50] sm:$0xff]  ;;  %s280_s21 = scalar_lea.vmem %s1064_s7, %s663_s25 }
  0x10   : > { %v282_v17 = vld [vmem:[%s967_s10] sm:$0xff]  ;;  %820 = vmatprep.subr.bf16.mxu1 %v819_v23  ;;  %v283_v29 = vld [vmem:[%s967_s10 + $0x8] sm:$0xff] }
  0x11   : > { %738 = vmatprep.mubr.msk.f32.mxu0 %vm302_vm0, %v282_v17  ;;  %802 = vmatpush3.bf16.msra.mxu0 %v799_v12  ;;  %v495_v53 = vld [vmem:[%s1062_s5 + $0x40] sm:$0xff] }
  0x12   : > { %804 = vmatprep.subr.bf16.mxu0 %v803_v20  ;;  %v847_v55 = vpack.c.bf16 %v496_v54, %v495_v53  ;;  %v669_v57 = vld [vmem:[%s1061_s4] ss:$0 sm:$0xff] }
  0x13   : > { %822 = vmatpush3.bf16.msra.mxu1 %v819_v23  ;;  %v672_v0 = vld [vmem:[%s1063_s6] ss:$0 sm:$0xff] }
  0x14   : > { %824 = vmatprep.subr.bf16.mxu1 %v823_v27 }
  0x15   : > { %806 = vmatpush3.bf16.msra.mxu0 %v803_v20 }
  0x16   : > { %808 = vmatprep.subr.bf16.mxu0 %v807_v26 }
  0x17   : > { %826 = vmatpush3.bf16.msra.mxu1 %v823_v27 }
  0x18   : > { %828 = vmatprep.subr.bf16.mxu1 %v827_v32 }
  0x19   : > { %810 = vmatpush3.bf16.msra.mxu0 %v807_v26 }
  0x1a   : > { %736 = vmatprep.subr.mxu0 %v294_v28 }
  0x1b   : > { %830 = vmatpush3.bf16.msra.mxu1 %v827_v32 }
  0x1c   : > { %761 = vmatprep.subr.mxu1 %v396_v33 }
  0x1d   : > { %737 = vmatpush3.msra.mxu0 %v294_v28 }
  0x1e   : > { %739 = vmatmul.mubr.msk.f32.vlgmr.msra.gmra.mrb[0].mxu0 %vm302_vm0, %v283_v29  ;;  %832 = vmatprep.subr.bf16.mxu0 %v831_v37 }
  0x1f   : > { %762 = vmatpush3.msra.mxu1 %v396_v33  ;;  %834 = vmatpush3.bf16.msra.mxu0 %v831_v37 }
  0x20   : > { %836 = vmatprep.subr.bf16.mxu0 %v835_v39 }
  0x23   : > { %838 = vmatpush3.bf16.msra.mxu0 %v835_v39 }
  0x24   : > { %840 = vmatprep.subr.bf16.mxu0 %v839_v42 }
  0x27   : > { %842 = vmatpush3.bf16.msra.mxu0 %v839_v42 }
  0x28   : > { %844 = vmatprep.subr.bf16.mxu0 %v843_v45 }
  0x2b   : > { %846 = vmatpush3.bf16.msra.mxu0 %v843_v45 }
  0x2c   : > { %848 = vmatprep.subr.bf16.mxu0 %v847_v55 }
  0x2f   : > { %850 = vmatpush3.bf16.msra.mxu0 %v847_v55 }
  0x30   : > { %786 = vmatprep.subr.mxu0 %v497_v56 }
  0x33   : > { %787 = vmatpush3.msra.mxu0 %v497_v56 }
  0xf1   : > { %v740_v47 = vpop.f32.mrb[0].mxu0 }
  0xf2   : > { %v381_v48 = vadd.f32 %v740_v47, %v666_v46  ;;  %v375_v49 = vpop.f32.mrb[1].mxu0 }
  0xf3   : > { %v376_v50 = vadd.f32 %v666_v46, %v375_v49 }
  0xf4   : > { %v385_v52 = vmax.f32 %v381_v48, 0.0 }
  0xf5   : > { %v384_v51 = vmax.f32 %v376_v50, 0.0 }
  0xf7   : > { %763 = vmatprep.mubr.msk.f32.mxu1 %vm302_vm0, %v384_v51 }
  0xf8   : > { %764 = vmatmul.mubr.msk.f32.vlgmr.msra.gmra.mrb[0].mxu1 %vm302_vm0, %v385_v52 }
 0x1cb   : > { %v765_v58 = vpop.f32.mrb[0].mxu1 }
 0x1cc   : > { %v482_v59 = vadd.f32 %v765_v58, %v669_v57  ;;  %v476_v60 = vpop.f32.mrb[1].mxu1 }
 0x1cd   : > { %v477_v61 = vadd.f32 %v669_v57, %v476_v60 }
 0x1ce   : > { %v486_v63 = vmax.f32 %v482_v59, 0.0 }
 0x1cf   : > { %v485_v62 = vmax.f32 %v477_v61, 0.0 }
 0x1d1   : > { %788 = vmatprep.mubr.msk.f32.mxu0 %vm302_vm0, %v485_v62 }
 0x1d2   : > { %789 = vmatmul.mubr.msk.f32.vlgmr.msra.gmra.mrb[2].mxu0 %vm302_vm0, %v486_v63 }
 0x2a5   : > { %v790_v1 = vpop.f32.mrb[2].mxu0 }
 0x2a6   : > { %v583_v2 = vadd.f32 %v790_v1, %v672_v0  ;;  %v577_v3 = vpop.f32.mrb[3].mxu0 }
 0x2a7   : > { %v578_v4 = vadd.f32 %v672_v0, %v577_v3 }
 0x2a8   : > { %v587_v5 = vsub.f32 0.0, %v583_v2 }
 0x2a9   : > { %v586_v6 = vsub.f32 0.0, %v578_v4 }
 0x2aa   : > { %v590_v7 = vmul.f32 1.442695, %v587_v5 }
 0x2ab   : > { %v588_v8 = vmul.f32 1.442695, %v586_v6 }
 0x2ac   : > { %859 = vpow2.f32 %v590_v7 }
 0x2ad   : > { %861 = vpow2.f32 %v588_v8 }
 0x2b6   : > { %v860_v9 = vpop.eup %859 }
 0x2b7   : > { %v862_v10 = vpop.eup %861  ;;  %v593_v11 = vadd.f32 1.0, %v860_v9 }
 0x2b8   : > { %v592_v12 = vadd.f32 1.0, %v862_v10 }
 0x2ba   : > { %863 = vrcp.f32 %v592_v12 }
 0x2bb   : > { %865 = vrcp.f32 %v593_v11 }
 0x2c4   : > { %v864_v13 = vpop.eup %863 }
 0x2c5   : > { %v866_v14 = vpop.eup %865  ;;  %599 = vst.msk [vmem:[%s280_s21] sm:$0xff] %vm598_vm1, %v864_v13 }
 0x2c6   : > { %600 = vst.msk [vmem:[%s280_s21 + $0x8] sm:$0xff] %vm598_vm1, %v866_v14 }
 0x2c7 PF: > { %s17_s24 = sadd.s32 1, %s873_s24  }
 0x2c8   : > { %p14_p4 = scmp.ge.s32.totalorder %s17_s24, 4  }
 0x2ca   :  { %16 = sbr.rel (!%p14_p4) target bundleno = 1 (0x1), region = 78 }

</bundles_post_ra>
